<compile_context>
chip_gen: v7x
topology: tpu7x:2x2x1
jax: 0.10.0
libtpu: 0.0.40
codegen_flags: <defaults>
</compile_context>

<pallas_src>
import jax
import jax.numpy as jnp
from jax import lax
from jax.experimental import pallas as pl
from jax.experimental.pallas import tpu as pltpu


_LANE = 128       # TPU lane width
_TC_MAX = 4096    # max columns per grid step (~256 KiB x-tile + ~256 KiB out-tile @ f32, V=W=16)


def _round_up(x, m):
    return (x + m - 1) // m * m


def _nconv_kernel(a_ref, x_ref, o_ref):
    # a_ref: (V, W) resident adjacency; x_ref: (V, TC) column tile; o_ref: (W, TC)
    # out[w, t] = sum_v a[v, w] * x[v, t]  -> contract dim 0 of both operands (A^T @ X).
    o_ref[...] = lax.dot_general(
        a_ref[...], x_ref[...],
        dimension_numbers=(((0,), (0,)), ((), ())),
        preferred_element_type=jnp.float32,
    ).astype(o_ref.dtype)


@jax.jit
def nconv(x, A):
    """Pallas implementation of einsum('ncvl,vw->ncwl', x, A)."""
    N, C, V, L = x.shape
    V2, W = A.shape
    assert V == V2, f"V mismatch: {V} vs {V2}"

    A = A.astype(x.dtype)

    # Lane-dense 2-D view: contraction axis (V) on sublanes, (n, c, l) batch on lanes.
    ncl = N * C * L
    x2 = jnp.transpose(x, (2, 0, 1, 3)).reshape(V, ncl)

    # Column tiling: tiles are multiples of 128 lanes; pad the column axis with
    # zeros so the tile evenly divides it (padding is sliced off afterwards).
    if ncl <= _TC_MAX:
        ncl_pad = _round_up(ncl, _LANE)
        tc = ncl_pad
    else:
        tc = _TC_MAX
        ncl_pad = _round_up(ncl, tc)
    if ncl_pad != ncl:
        x2 = jnp.pad(x2, ((0, 0), (0, ncl_pad - ncl)))

    grid = (ncl_pad // tc,)

    out2 = pl.pallas_call(
        _nconv_kernel,
        out_shape=jax.ShapeDtypeStruct((W, ncl_pad), x.dtype),
        grid_spec=pltpu.PrefetchScalarGridSpec(
            num_scalar_prefetch=0,
            grid=grid,
            in_specs=[
                pl.BlockSpec((V, W), lambda j: (0, 0)),    # A: constant index -> resident
                pl.BlockSpec((V, tc), lambda j: (0, j)),   # x column tile (lane-dense)
            ],
            out_specs=pl.BlockSpec((W, tc), lambda j: (0, j)),
        ),
        compiler_params=pltpu.CompilerParams(
            dimension_semantics=("parallel",),  # independent column tiles -> megacore sharding
        ),
    )(A, x2)

    out2 = out2[:, :ncl]                                   # drop column padding
    # (W, N*C*L) -> (N, C, W, L)  (torch .contiguous() is a no-op in JAX)
    return jnp.transpose(out2.reshape(W, N, C, L), (1, 2, 0, 3))


def nconv_ref(x, A):
    return jnp.einsum('ncvl,vw->ncwl', x, A)


if __name__ == "__main__":
    key = jax.random.PRNGKey(0)
    kx, ka = jax.random.split(key)

    # Small shapes consistent with the module: batch=2, channels=4,
    # num_nodes V=16 (A is V x V adjacency), seq length L=8.
    N, C, V, L = 2, 4, 16, 8
    x = jax.random.normal(kx, (N, C, V, L), dtype=jnp.float32)
    A = jax.random.normal(ka, (V, V), dtype=jnp.float32)

    out = nconv(x, A)
    out = jax.block_until_ready(out)

    ref = nconv_ref(x, A)
    assert out.shape == (N, C, V, L)
    assert jnp.allclose(out, ref, atol=1e-5, rtol=1e-5), "mismatch vs reference"

    print("KERNEL_OK")
</pallas_src>

<mosaic_0001>
module attributes {stable_mosaic.version = 11 : i64} {
  func.func @_nconv_kernel(%arg0: i32, %arg1: memref<16x16xf32, #tpu.memory_space<vmem>>, %arg2: memref<16x128xf32, #tpu.memory_space<vmem>>, %arg3: memref<16x128xf32, #tpu.memory_space<vmem>>) attributes {dimension_semantics = [#tpu.dimension_semantics<parallel>], iteration_bounds = array<i64: 1>, scalar_prefetch = 0 : i64, scratch_operands = 0 : i64, tpu.core_type = #tpu.core_type<tc>, window_params = [{pipeline_mode = #tpu.pipeline_mode<synchronous>, transform_indices = @transform_0, window_bounds = array<i64: 16, 16>}, {transform_indices = @transform_1, window_bounds = array<i64: 16, 128>}, {transform_indices = @transform_2, window_bounds = array<i64: 16, 128>}]} {
    %c0 = arith.constant 0 : index
    %c0_0 = arith.constant 0 : index
    %0 = vector.load %arg1[%c0, %c0_0] : memref<16x16xf32, #tpu.memory_space<vmem>>, vector<16x16xf32>
    %c0_1 = arith.constant 0 : index
    %c0_2 = arith.constant 0 : index
    %1 = vector.load %arg2[%c0_1, %c0_2] : memref<16x128xf32, #tpu.memory_space<vmem>>, vector<16x128xf32>
    %cst = arith.constant dense<0.000000e+00> : vector<16x128xf32>
    %2 = tpu.matmul %0, %1, %cst {dimension_numbers = #tpu.dot_dimension_numbers<[0], [0], [1], [1], [0, 1, 1, 1], [], []>} : vector<16x16xf32>, vector<16x128xf32>, vector<16x128xf32> -> vector<16x128xf32>
    %c0_3 = arith.constant 0 : index
    %c0_4 = arith.constant 0 : index
    %3 = vector.load %arg3[%c0_3, %c0_4] : memref<16x128xf32, #tpu.memory_space<vmem>>, vector<16x128xf32>
    tpu.vector_store %arg3[%c0_3, %c0_4], %2 {strides = array<i32>} : memref<16x128xf32, #tpu.memory_space<vmem>>, vector<16x128xf32>,
    return
  }
  func.func @transform_0(%arg0: i32) -> (i32, i32) {
    %c0_i32 = arith.constant 0 : i32
    %c0_i32_0 = arith.constant 0 : i32
    %c0_i32_1 = arith.constant 0 : i32
    return %c0_i32, %c0_i32_0 : i32, i32
  }
  func.func @transform_1(%arg0: i32) -> (i32, i32) {
    %c0_i32 = arith.constant 0 : i32
    %c0_i32_0 = arith.constant 0 : i32
    return %c0_i32, %arg0 : i32, i32
  }
  func.func @transform_2(%arg0: i32) -> (i32, i32) {
    %c0_i32 = arith.constant 0 : i32
    %c0_i32_0 = arith.constant 0 : i32
    return %c0_i32, %arg0 : i32, i32
  }
}

</mosaic_0001>

<bundles_post_ra>
// kernel: nconv.1
= control target key start
LH: loop header
LB: loop body
LE: loop exit
PB: predicated region body
PF: predicated region fallthrough
CT: control target
= control target key end

     0   :  { %vm47_vm0 = vcmask 130048   ;;  %s186_s0 = inlined_call_operand.vmem [shape: f32[16,16], index: 0, kind: input, shape index: {}]   ;;  %s187_s1 = inlined_call_operand.vmem [shape: f32[16,128], index: 1, kind: input, shape index: {}]   ;;  %s188_s2 = inlined_call_operand.vmem [shape: f32[16,128], index: 2, kind: output, shape index: {}]  }
   0x1   :  { %v11_v0 = vld [vmem:[%s186_s0] sm:$0xff]  ;;  %v14_v2 = vld [vmem:[%s187_s1 + $0x8] sm:$0xff] }
   0x2   :  { %v13_v1 = vld [vmem:[%s187_s1] sm:$0xff]  ;;  %15 = vxpose.xlu0.b32.start [1/2] (short) (narrow) %v11_v0, 16  ;;  %v12_v3 = vld [vmem:[%s186_s0 + $0x8] sm:$0xff] }
   0x3   :  { %v148_v4 = vpack.c.bf16 %v14_v2, %v13_v1 }
   0x5   :  { %149 = vmatprep.subr.bf16.mxu0 %v148_v4 }
   0x6   :  { %16 = vxpose.xlu0.b32.end [2/2] (short) (narrow) %v12_v3, 16  ;;  %151 = vmatpush3.bf16.msra.mxu0 %v148_v4 }
  0x82   :  { %v31_v5 = vpop.trf.xlu0 }
  0x83   :  { %145 = vmatprep.mubr.msk.f32.mxu0 %vm47_vm0, %v31_v5 }
  0x86   :  { %v32_v6 = vpop.trf.xlu0 }
  0x87   :  { %146 = vmatmul.mubr.msk.f32.vlgmr.msra.gmra.mrb[0].mxu0 %vm47_vm0, %v32_v6 }
 0x15a   :  { %v147_v7 = vpop.f32.mrb[0].mxu0 }
 0x15b   :  { %130 = vst [vmem:[%s188_s2 + $0x8] sm:$0xff] %v147_v7  ;;  %v120_v8 = vpop.f32.mrb[1].mxu0 }
 0x15c   :  { %129 = vst [vmem:[%s188_s2] sm:$0xff] %v120_v8 }

</bundles_post_ra>
